<compile_context>
chip_gen: v5e
topology: v5e:2x2
jax: 0.10.0
libtpu: 0.0.40
codegen_flags: <defaults>
</compile_context>

<pallas_src>
import jax
import jax.numpy as jnp
from jax.experimental import pallas as pl
from jax.experimental.pallas import tpu as pltpu


def _round_up(n, m):
    return ((n + m - 1) // m) * m


def _sublane_mult(dtype):
    # (8,128) tile for 32-bit; sub-32-bit dtypes pack along sublanes.
    return max(8, 32 // jnp.dtype(dtype).itemsize)


def _cdist_kernel(x_ref, pt_ref, p_sq_ref, o_ref):
    # x_ref:    (TILE_B, D)     current batch tile
    # pt_ref:   (D, C_pad)      pre-transposed prototypes, resident
    # p_sq_ref: (1, C_pad)      squared prototype norms (precomputed, resident)
    # o_ref:    (TILE_B, C_pad) lane-dense distance tile
    x = x_ref[...]

    x_f32 = x.astype(jnp.float32)
    # Row-norm reduce stays in-kernel: for this kernel the vex slot is not the
    # bottleneck, so the XLU reduce is free filler next to the MXU pushes.
    x_sq = jnp.sum(x_f32 * x_f32, axis=-1, keepdims=True)        # (TILE_B, 1)

    # <x[b], p[c]> on the MXU; native-dtype operands, f32 accumulation.
    # Plain (M,K)x(K,N) contraction -> no per-tile RHS transpose.
    xp = jax.lax.dot_general(
        x, pt_ref[...],
        dimension_numbers=(((1,), (0,)), ((), ())),
        preferred_element_type=jnp.float32,
    )                                                            # (TILE_B, C_pad)

    d_sq = x_sq + p_sq_ref[...] - 2.0 * xp
    d_sq = jnp.maximum(d_sq, 0.0)                                # numerical clamp
    o_ref[...] = jnp.sqrt(d_sq).astype(o_ref.dtype)


def _max_tile_rows(D, C_pad, in_dtype, out_dtype,
                   budget_bytes=32 * 1024 * 1024):
    """Largest sublane-aligned B-tile whose working set fits `budget_bytes`.

    VMEM accounting is (8,128)-tile aware: lane dims round up to 128, row
    counts round up to the dtype sublane multiple.  Resident blocks are
    conservatively counted at 2 buffers.
    """
    in_item = jnp.dtype(in_dtype).itemsize
    out_item = jnp.dtype(out_dtype).itemsize
    sub_in = _sublane_mult(in_dtype)
    d_lanes = _round_up(D, 128)

    resident = (2 * _round_up(D, sub_in) * C_pad * in_item       # protos (D, C_pad)
                + 2 * 8 * C_pad * 4)                             # ||p||^2 row (1, C_pad)
    per_row = (2 * d_lanes * in_item                             # x, double-buffered
               + 2 * C_pad * out_item)                           # out, double-buffered

    avail = budget_bytes - resident
    row_mult = max(sub_in, 8)
    if avail < per_row * row_mult:
        return row_mult
    rows = (avail // per_row) // row_mult * row_mult
    return max(row_mult, int(rows))


def _choose_tile_b(B, max_rows, row_mult):
    """Pick tile_b <= max_rows, preferring no x-padding and >=2 programs on v7x."""
    B_r = _round_up(B, row_mult)
    if B_r <= max_rows:
        # Large single-tile batch: split in two so v7x's second TC is not idle.
        if B_r >= 2048:
            return _round_up((B_r + 1) // 2, row_mult)
        return B_r
    max_tile = (max_rows // row_mult) * row_mult
    # Prefer a tile that divides B exactly (avoids the jnp.pad HBM pass on x).
    for tile in range(max_tile, row_mult - 1, -row_mult):
        if B % tile == 0:
            return tile
    return max_tile


def _resident_spec(block_shape):
    """Constant-index-map BlockSpec, single-buffered when supported."""
    idx = lambda i: (0, 0)
    try:
        return pl.BlockSpec(block_shape, idx, pipeline_mode=pl.Buffered(1))
    except TypeError:  # older API without pipeline_mode
        return pl.BlockSpec(block_shape, idx)


def class_prototype_attention(x, prototypes):
    """Pallas implementation of ClassPrototypeAttention.forward.

    Args:
      x:          (B, D) embeddings.
      prototypes: (C, D) class prototypes.
    Returns:
      distances:  (B, 1, C) Euclidean distances (torch.cdist of (B,1,D) vs
                  (1,C,D)), in the promoted input dtype.
    """
    B, D = x.shape
    C, D2 = prototypes.shape
    assert D == D2

    out_dtype = jnp.result_type(x.dtype, prototypes.dtype)

    # Lane-dense output columns; 256 for large C fills the v6e/v7x 2x256 MXU.
    lane_mult = 256 if C >= 512 else 128
    C_pad = _round_up(C, lane_mult)

    row_mult = max(_sublane_mult(x.dtype), 8)
    max_rows = _max_tile_rows(D, C_pad, x.dtype, out_dtype)
    tile_b = _choose_tile_b(B, max_rows, row_mult)
    B_pad = _round_up(B, tile_b)

    x_p = x if B_pad == B else jnp.pad(x, ((0, B_pad - B), (0, 0)))
    protos_p = (prototypes if C_pad == C
                else jnp.pad(prototypes, ((0, C_pad - C), (0, 0))))

    # One-time, parameter-derived wrapper ops (outside the hot loop):
    protos_t = jnp.transpose(protos_p)                           # (D, C_pad)
    p_f32 = protos_p.astype(jnp.float32)
    p_sq_row = jnp.sum(p_f32 * p_f32, axis=-1)[None, :]          # (1, C_pad)

    grid = (B_pad // tile_b,)

    in_item = jnp.dtype(x.dtype).itemsize
    out_item = jnp.dtype(out_dtype).itemsize
    cost = pl.CostEstimate(
        flops=2 * B_pad * C_pad * D,
        transcendentals=B_pad * C_pad,
        bytes_accessed=(B_pad * D * in_item          # x read
                        + D * C_pad * in_item        # prototypes read (once)
                        + C_pad * 4                  # ||p||^2 row read (once)
                        + B_pad * C_pad * out_item), # output write
    )

    dist = pl.pallas_call(
        _cdist_kernel,
        out_shape=jax.ShapeDtypeStruct((B_pad, C_pad), out_dtype),
        grid_spec=pltpu.PrefetchScalarGridSpec(
            num_scalar_prefetch=0,
            grid=grid,
            in_specs=[
                pl.BlockSpec((tile_b, D), lambda i: (i, 0)),     # x: tiled over B
                _resident_spec((D, C_pad)),                      # prototypes^T: resident
                _resident_spec((1, C_pad)),                      # ||p||^2 row: resident
            ],
            out_specs=pl.BlockSpec((tile_b, C_pad), lambda i: (i, 0)),
        ),
        compiler_params=pltpu.CompilerParams(
            dimension_semantics=("parallel",),                   # v7x dual-TC sharding
            vmem_limit_bytes=48 * 1024 * 1024,                   # headroom under v7x 64 MiB
        ),
        cost_estimate=cost,
    )(x_p, protos_t, p_sq_row)

    # Only slice when padding actually exists (the slice is an extra HBM pass).
    if B_pad != B or C_pad != C:
        dist = dist[:B, :C]
    return dist[:, None, :]


def _reference(x, prototypes):
    return jnp.sqrt(
        jnp.sum((x[:, None, :] - prototypes[None, :, :]) ** 2, axis=-1)
    )[:, None, :]


if __name__ == "__main__":
    num_classes = 4
    embedding_dim = 32
    batch = 8

    key = jax.random.PRNGKey(0)
    k_x, k_p, k_x2 = jax.random.split(key, 3)

    # Deterministic "parameter" init (stand-in for torch.randn in __init__).
    prototypes = jax.random.normal(k_p, (num_classes, embedding_dim), jnp.float32)
    x = jax.random.normal(k_x, (batch, embedding_dim), jnp.float32)

    out = class_prototype_attention(x, prototypes)
    out = jax.block_until_ready(out)
    ref = _reference(x, prototypes)
    assert out.shape == (batch, 1, num_classes)
    assert out.dtype == ref.dtype
    assert jnp.allclose(out, ref, atol=1e-4, rtol=1e-4)

    # Second check: a batch that is not the same size (exercises tile re-pick).
    batch2 = 24
    x2 = jax.random.normal(k_x2, (batch2, embedding_dim), jnp.float32)
    out2 = jax.block_until_ready(class_prototype_attention(x2, prototypes))
    ref2 = _reference(x2, prototypes)
    assert out2.shape == (batch2, 1, num_classes)
    assert jnp.allclose(out2, ref2, atol=1e-4, rtol=1e-4)

    print("KERNEL_OK")
</pallas_src>

<mosaic_0001>
module attributes {stable_mosaic.version = 11 : i64} {
  func.func @_cdist_kernel(%arg0: i32, %arg1: memref<8x32xf32, #tpu.memory_space<vmem>>, %arg2: memref<32x128xf32, #tpu.memory_space<vmem>>, %arg3: memref<1x128xf32, #tpu.memory_space<vmem>>, %arg4: memref<8x128xf32, #tpu.memory_space<vmem>>) attributes {dimension_semantics = [#tpu.dimension_semantics<parallel>], iteration_bounds = array<i64: 1>, scalar_prefetch = 0 : i64, scratch_operands = 0 : i64, tpu.core_type = #tpu.core_type<tc>, window_params = [{transform_indices = @transform_0, window_bounds = array<i64: 8, 32>}, {pipeline_mode = #tpu.pipeline_mode<synchronous>, transform_indices = @transform_1, window_bounds = array<i64: 32, 128>}, {pipeline_mode = #tpu.pipeline_mode<synchronous>, transform_indices = @transform_2, window_bounds = array<i64: 1, 128>}, {transform_indices = @transform_3, window_bounds = array<i64: 8, 128>}]} {
    %c0 = arith.constant 0 : index
    %c0_0 = arith.constant 0 : index
    %0 = vector.load %arg1[%c0, %c0_0] : memref<8x32xf32, #tpu.memory_space<vmem>>, vector<8x32xf32>
    %1 = arith.mulf %0, %0 : vector<8x32xf32>
    %cst = arith.constant dense<0.000000e+00> : vector<8xf32>
    %2 = vector.multi_reduction <add>, %1, %cst [1] : vector<8x32xf32> to vector<8xf32>
    %3 = vector.shape_cast %2 : vector<8xf32> to vector<8x1xf32>
    %c0_1 = arith.constant 0 : index
    %c0_2 = arith.constant 0 : index
    %4 = vector.load %arg2[%c0_1, %c0_2] : memref<32x128xf32, #tpu.memory_space<vmem>>, vector<32x128xf32>
    %cst_3 = arith.constant dense<0.000000e+00> : vector<8x128xf32>
    %5 = tpu.matmul %0, %4, %cst_3 {dimension_numbers = #tpu.dot_dimension_numbers<[1], [0], [0], [1], [0, 0, 1, 1], [], []>} : vector<8x32xf32>, vector<32x128xf32>, vector<8x128xf32> -> vector<8x128xf32>
    %c0_4 = arith.constant 0 : index
    %c0_5 = arith.constant 0 : index
    %6 = vector.load %arg3[%c0_4, %c0_5] : memref<1x128xf32, #tpu.memory_space<vmem>>, vector<1x128xf32>
    %7 = vector.broadcast %3 : vector<8x1xf32> to vector<8x128xf32>
    %8 = vector.broadcast %6 : vector<1x128xf32> to vector<8x128xf32>
    %9 = arith.addf %7, %8 : vector<8x128xf32>
    %cst_6 = arith.constant 2.000000e+00 : f32
    %10 = vector.broadcast %cst_6 : f32 to vector<8x128xf32>
    %11 = arith.mulf %10, %5 : vector<8x128xf32>
    %12 = arith.subf %9, %11 : vector<8x128xf32>
    %cst_7 = arith.constant 0.000000e+00 : f32
    %13 = vector.broadcast %cst_7 : f32 to vector<8x128xf32>
    %14 = arith.maximumf %12, %13 : vector<8x128xf32>
    %15 = math.sqrt %14 : vector<8x128xf32>
    %c0_8 = arith.constant 0 : index
    %c0_9 = arith.constant 0 : index
    %16 = vector.load %arg4[%c0_8, %c0_9] : memref<8x128xf32, #tpu.memory_space<vmem>>, vector<8x128xf32>
    tpu.vector_store %arg4[%c0_8, %c0_9], %15 {strides = array<i32>} : memref<8x128xf32, #tpu.memory_space<vmem>>, vector<8x128xf32>,
    return
  }
  func.func @transform_0(%arg0: i32) -> (i32, i32) {
    %c0_i32 = arith.constant 0 : i32
    %c0_i32_0 = arith.constant 0 : i32
    return %arg0, %c0_i32 : i32, i32
  }
  func.func @transform_1(%arg0: i32) -> (i32, i32) {
    %c0_i32 = arith.constant 0 : i32
    %c0_i32_0 = arith.constant 0 : i32
    %c0_i32_1 = arith.constant 0 : i32
    return %c0_i32, %c0_i32_0 : i32, i32
  }
  func.func @transform_2(%arg0: i32) -> (i32, i32) {
    %c0_i32 = arith.constant 0 : i32
    %c0_i32_0 = arith.constant 0 : i32
    %c0_i32_1 = arith.constant 0 : i32
    return %c0_i32, %c0_i32_0 : i32, i32
  }
  func.func @transform_3(%arg0: i32) -> (i32, i32) {
    %c0_i32 = arith.constant 0 : i32
    %c0_i32_0 = arith.constant 0 : i32
    return %arg0, %c0_i32 : i32, i32
  }
}

</mosaic_0001>

<bundles_post_ra>
// kernel: tpu_custom_call.1
= control target key start
LH: loop header
LB: loop body
LE: loop exit
PB: predicated region body
PF: predicated region fallthrough
CT: control target
= control target key end

     0   :  { %8 = vsyncpa [#allocation3], 0  ;;  %s241_s0 = inlined_call_operand.hbm [shape: f32[8,32], index: 0, kind: input, shape index: {}]   ;;  %s242_s1 = inlined_call_operand.hbm [shape: f32[32,128], index: 1, kind: input, shape index: {}]   ;;  %s243_s2 = inlined_call_operand.vmem [shape: f32[1,128], index: 2, kind: input, shape index: {}]   ;;  %s244_s3 = inlined_call_operand.hbm [shape: f32[8,128], index: 3, kind: output, shape index: {}]  }
   0x1   :  { %9 = vsyncpa [#allocation6], 0 }
   0x2   :  { %10 = vsyncpa [#allocation4], 0  ;;  %s16_s14 = sshll.u32 %s241_s0, 4  ;;  %s204_s15 = smov [#allocation2]   ;;  %s17_s14 = int_to_ptr.hbm [resolvable:$true] %s16_s14 }
   0x3   :  { %s18_s16 = sshll.u32 %s204_s15, 4  ;;  %s26_s19 = sshll.u32 %s242_s1, 4  ;;  %s19_s16 = int_to_ptr.vmem [resolvable:$true] %s18_s16  ;;  %s27_s19 = int_to_ptr.hbm [resolvable:$true] %s26_s19 }
   0x4   :  { %21 = dma.hbm_to_vmem [thread:$0]  %s17_s14, 128, %s19_s16, [#allocation3]  }
   0x5   :  { %s205_s20 = smov [#allocation5]   ;;  %s206_s22 = smov 128  }
   0x6   :  { %s28_s21 = sshll.u32 %s205_s20, 4  ;;  %s207_s23 = smov 8   ;;  %s29_s21 = int_to_ptr.vmem [resolvable:$true] %s28_s21 }
   0x7   :  { %34 = dma.hbm_to_vmem [thread:$0]  %s27_s19, 512, %s29_s21, [#allocation6], %s206_s22, %s206_s22, %s207_s23  }
   0x8   :  { %198 = dma.done.wait [#allocation3], 128  }
   0x9   :  { %199 = vsyncadd [#allocation3], 4294967168 }
   0xa   :  { %200 = dma.done.wait [#allocation6], 512  }
   0xb   :  { %201 = vsyncadd [#allocation6], 4294966784  ;;  %v54_v0 = vld [vmem:[#allocation5 + $0x18] sm:$0xff]  ;;  %v53_v1 = vld [vmem:[#allocation5 + $0x10] sm:$0xff]  ;;  %vm47_vm0 = vcmask 261120   ;;  %s208_s24 = smov [#allocation7]  }
   0xc   :  { %70 = vmatpush.msra.mxu0 %v54_v0  ;;  %v45_v2 = vld [vmem:[#allocation2] sm:$0xff]  ;;  %v52_v3 = vld [vmem:[#allocation5 + $0x8] sm:$0xff]  ;;  %v51_v5 = vld [vmem:[#allocation5] sm:$0xff]  ;;  %s104_s25 = sshll.u32 %s208_s24, 4  ;;  %s106_s28 = sshll.u32 %s244_s3, 4  ;;  %s105_s25 = int_to_ptr.vmem [resolvable:$true] %s104_s25  ;;  %s107_s28 = int_to_ptr.hbm [resolvable:$true] %s106_s28 }
   0xd   :  { %v46_v4 = vmul.f32 %v45_v2, %v45_v2  ;;  %v123_v7 = vld [vmem:[%s243_s2] ss:$0 sm:$0xff] }
   0xe   :  { %71 = vmatpush.msra.mxu0 %v53_v1 }
   0xf   :  { %v48_v6 = vsel %vm47_vm0, %v46_v4, 0.0 }
  0x10   :  { %72 = vmatpush.msra.mxu0 %v52_v3  ;;  %49 = vadd.xlane.f32.xlu0 %v48_v6 }
  0x12   :  { %73 = vmatpush.msra.mxu0 %v51_v5 }
  0x13   :  { %117 = vmatmul.msk.f32.vlgmr.msra.gmra.mxu0 %vm47_vm0, %v45_v2 }
  0x83   :  { %v50_v8 = vpop.xlane.xlu0 %49 }
  0x84   :  { %v82_v9 = vadd.f32 %v123_v7, %v50_v8 }
  0x90   :  { %v75_v10 = vpop.f32.mrf.mxu0 }
  0x91   :  { %v83_v11 = vmul.f32 2.0, %v75_v10 }
  0x93   :  { %v84_v12 = vsub.f32 %v82_v9, %v83_v11 }
  0x95   :  { %v85_v13 = vmax.f32 %v84_v12, 0.0 }
  0x97   :  { %124 = vrsqrt.f32 %v85_v13  ;;  %vm93_vm1 = vcmp.eq.f32.partialorder %v85_v13, inf  ;;  %v96_v21 = vand.u32 2147483648, %v85_v13  ;;  %vm95_vm2 = vcmp.eq.f32.partialorder %v85_v13, 0.0 }
  0x9d   :  { %v125_v14 = vpop.eup %124 }
  0x9e   :  { %v87_v15 = vmul.f32 %v125_v14, %v85_v13 }
  0xa0   :  { %v88_v16 = vmul.f32 %v125_v14, %v87_v15 }
  0xa2   :  { %v89_v17 = vmul.f32 0.5, %v88_v16 }
  0xa4   :  { %v90_v18 = vsub.f32 1.5, %v89_v17 }
  0xa6   :  { %v91_v19 = vmul.f32 %v125_v14, %v90_v18 }
  0xa8   :  { %v92_v20 = vmul.f32 %v91_v19, %v85_v13 }
  0xaa   :  { %v94_v22 = vsel %vm93_vm1, %v85_v13, %v92_v20 }
  0xab   :  { %v97_v23 = vsel %vm95_vm2, %v96_v21, %v94_v22 }
  0xac   :  { %98 = vst [vmem:[#allocation7] sm:$0xff] %v97_v23 }
  0xad   :  { %109 = dma.vmem_to_hbm [thread:$0]  %s105_s25, 128, %s107_s28, [#allocation4]  }
  0xae   :  { %202 = dma.done.wait [#allocation4], 128  }
  0xaf   :  { %203 = vsyncadd [#allocation4], 4294967168 }
  0xb0   :  { %114 = vsyncpa [#allocation3], 1 }
  0xb1   :  { %115 = vsyncpa [#allocation6], 1 }
  0xb2   :  { %116 = vsyncpa [#allocation4], 1 }

</bundles_post_ra>
